<compile_context>
chip_gen: v5e
topology: v5e:2x2
jax: 0.10.0
libtpu: 0.0.40
codegen_flags: <defaults>
</compile_context>

<pallas_src>
import jax
import jax.numpy as jnp
from jax.experimental import pallas as pl
from jax.experimental.pallas import tpu as pltpu

_LANE = 128
_SUBLANE = 8


def _round_up(n, m):
    return ((n + m - 1) // m) * m


# ---------------------------------------------------------------------------
# Kernel 1: one relational-GCN layer, all relations fused in a single invocation.
#   out[tile] = concat_r( (A_r[tile] @ X) * inv_deg_r ) @ stacked_W  +  sum_r b_r
# ---------------------------------------------------------------------------
def _rgcn_layer_kernel(a_ref, invdeg_ref, x_ref, w_ref, b_ref, out_ref):
    # a_ref      : (R, Td, N_src)  bf16  0/1 adjacency (dst x src)
    # invdeg_ref : (R, Td, 1)      f32   precomputed 1 / clamp(in_degree, 1)
    # x_ref      : (N_src, F_in)   bf16  source-node features (F_in padded to 128)
    # w_ref      : (R*F_in, F_out) bf16  relation weights stacked along K
    # b_ref      : (1, F_out)      f32   pre-summed biases
    # out_ref    : (Td, F_out)     f32
    x = x_ref[...]                                     # loaded once, reused by all relations
    num_rel = a_ref.shape[0]                           # static

    parts = []
    for r in range(num_rel):                           # static unroll (R is small)
        # neighbor aggregation on the MXU (bf16 x bf16 -> f32 accumulate)
        agg = jnp.dot(a_ref[r], x, preferred_element_type=jnp.float32)   # (Td, F_in)
        # norm='right' with clamp(min=1): exact factors, computed outside the kernel
        agg = agg * invdeg_ref[r]                                        # (Td, 1) broadcast
        parts.append(agg.astype(jnp.bfloat16))
    # merge the R feature transforms into ONE matmul with contraction dim K = R*F_in
    agg_cat = jnp.concatenate(parts, axis=-1)                            # (Td, R*F_in) bf16
    out = jnp.dot(agg_cat, w_ref[...], preferred_element_type=jnp.float32) + b_ref[...]
    out_ref[...] = out                                                   # single lane-dense store


def _pick_dst_block(n_dst, row_bytes, fixed_bytes, budget):
    """Largest dst tile (multiple of 8, dividing n_dst) fitting the VMEM budget.

    Prefers >= 2 grid steps so the "parallel" axis can shard across v7x's two TCs
    (one extra grid step costs ~0.35us on single-TC parts -- negligible).
    """
    cands = [d for d in range(_SUBLANE, n_dst + 1, _SUBLANE) if n_dst % d == 0]
    if not cands:
        return n_dst                                    # awkward n_dst: single full block
    avail = max(budget - fixed_bytes, row_bytes * _SUBLANE)
    fitting = [d for d in cands if d * row_bytes <= avail] or [cands[0]]
    multi = [d for d in fitting if n_dst // d >= 2]
    return max(multi) if multi else max(fitting)


def rgcn_layer(a, x, w, b, *, dst_block=None, vmem_budget=32 * 1024 * 1024):
    """One HeteroGraphConv layer (GraphConv(norm='right') per relation, 'sum' aggregate).

    a: (R, N_dst, N_src) 0/1, x: (N_src, F_in), w: (R, F_in, F_out), b: (R, F_out).
    F_in / F_out are expected padded to multiples of 128 (see Model.__init__).
    """
    R, n_dst, n_src = a.shape
    _, f_in, f_out = w.shape
    assert x.shape == (n_src, f_in), (x.shape, (n_src, f_in))

    # Exact right-normalization, precomputed once (removes the in-kernel cast + XLU reduce
    # + approx reciprocal of the previous version and the accuracy deviation with it).
    inv_deg = 1.0 / jnp.maximum(
        jnp.sum(a.astype(jnp.float32), axis=-1, keepdims=True), 1.0)     # (R, N_dst, 1) f32

    # 0/1 adjacency is exact in bf16; features/weights bf16, f32 accumulation on the MXU.
    a_bf = a.astype(jnp.bfloat16)
    x_bf = x.astype(jnp.bfloat16)
    w_bf = w.astype(jnp.bfloat16).reshape(R * f_in, f_out)               # stacked along K
    b_sum = jnp.sum(b.astype(jnp.float32), axis=0).reshape(1, f_out)     # biases summed once

    # VMEM sizing: double-buffered per-dst-row tiles vs. resident operands.
    row_bytes = 2 * (R * n_src * 2 + R * 4 + f_out * 4)                  # A + inv_deg + out
    fixed_bytes = 2 * (n_src * f_in * 2 + R * f_in * f_out * 2 + f_out * 4)  # X, W, b
    if dst_block is None:
        dst_block = _pick_dst_block(n_dst, row_bytes, fixed_bytes, vmem_budget)
    assert n_dst % dst_block == 0
    grid = (n_dst // dst_block,)

    needed = fixed_bytes + dst_block * row_bytes
    vmem_limit = int(min(max(2 * needed, 8 << 20), 64 << 20))            # under v7x's 64 MiB

    flops = 2 * n_dst * (R * n_src * f_in + R * f_in * f_out)
    bytes_accessed = (a_bf.size * 2 + inv_deg.size * 4 + x_bf.size * 2
                      + w_bf.size * 2 + b_sum.size * 4 + n_dst * f_out * 4)
    cost = pl.CostEstimate(flops=flops, transcendentals=0, bytes_accessed=bytes_accessed)

    # TODO(synk): for very large sampled graphs the src axis must also be tiled (K-loop on
    # A@X); the precomputed global inv_deg keeps normalization correct in that case too.
    return pl.pallas_call(
        _rgcn_layer_kernel,
        out_shape=jax.ShapeDtypeStruct((n_dst, f_out), jnp.float32),
        grid=grid,
        in_specs=[
            pl.BlockSpec((R, dst_block, n_src), lambda i: (0, i, 0)),
            pl.BlockSpec((R, dst_block, 1), lambda i: (0, i, 0)),
            pl.BlockSpec((n_src, f_in), lambda i: (0, 0)),
            pl.BlockSpec((R * f_in, f_out), lambda i: (0, 0)),
            pl.BlockSpec((1, f_out), lambda i: (0, 0)),
        ],
        out_specs=pl.BlockSpec((dst_block, f_out), lambda i: (i, 0)),
        compiler_params=pltpu.CompilerParams(
            dimension_semantics=("parallel",),         # dst tiles shard across TCs (v7x)
            vmem_limit_bytes=vmem_limit,
        ),
        cost_estimate=cost,
    )(a_bf, inv_deg, x_bf, w_bf, b_sum)


# ---------------------------------------------------------------------------
# Kernel 2: fused per-edge dot products for ALL score graphs in one launch.
# The endpoint gather happens IN-kernel via one-hot matmuls on the MXU, with the node
# embeddings resident in VMEM; output is a lane-dense (1, E) row.
# ---------------------------------------------------------------------------
def _edge_score_kernel(idx_ref, ht_ref, out_ref):
    # idx_ref : (2, Te) int32  row 0 = src ids, row 1 = dst ids
    # ht_ref  : (F, N)  f32    transposed node embeddings (resident across the grid)
    # out_ref : (1, Te) f32    lane-dense scores
    ht = ht_ref[...]
    n = ht.shape[1]
    te = out_ref.shape[1]
    src = idx_ref[0:1, :]                                                # (1, Te)
    dst = idx_ref[1:2, :]
    node_ids = jax.lax.broadcasted_iota(jnp.int32, (n, te), 0)           # (N, Te)
    # one-hot gather on the MXU: exact row selection (0/1 weights), no HBM round trip
    u = jnp.dot(ht, (node_ids == src).astype(ht.dtype), preferred_element_type=jnp.float32)
    v = jnp.dot(ht, (node_ids == dst).astype(ht.dtype), preferred_element_type=jnp.float32)
    out_ref[...] = jnp.sum(u * v, axis=0, keepdims=True)                 # (1, Te)


def _pick_e_block(e_pad, cap=4096):
    cands = [c for c in range(_LANE, min(cap, e_pad) + 1, _LANE) if e_pad % c == 0]
    if not cands:
        return e_pad
    multi = [c for c in cands if e_pad // c >= 2]
    return max(multi) if multi else max(cands)


def edge_scores_fused(h, src_idx, dst_idx, *, e_block=None):
    """h: (N, F); src_idx/dst_idx: (E,) int32. Returns (E,) scores <h[src], h[dst]>."""
    n, f = h.shape
    e = int(src_idx.shape[0])
    e_pad = _round_up(max(e, 1), _LANE)
    src = jnp.pad(src_idx.astype(jnp.int32), (0, e_pad - e))
    dst = jnp.pad(dst_idx.astype(jnp.int32), (0, e_pad - e))
    idx = jnp.stack([src, dst], axis=0)                 # (2, E_pad)
    ht = jnp.transpose(h.astype(jnp.float32))           # (F, N): tiny layout plumbing

    if e_block is None:
        e_block = _pick_e_block(e_pad)
    grid = (e_pad // e_block,)

    cost = pl.CostEstimate(flops=2 * e_pad * f * (2 * n + 1), transcendentals=0,
                           bytes_accessed=idx.size * 4 + ht.size * 4 + e_pad * 4)

    # TODO(synk): the one-hot gather is O(E*N*F) MXU work; for very large node counts
    # switch to a manual per-row DMA gather (memory_space=pl.ANY + make_async_copy).
    s = pl.pallas_call(
        _edge_score_kernel,
        out_shape=jax.ShapeDtypeStruct((1, e_pad), jnp.float32),
        grid=grid,
        in_specs=[
            pl.BlockSpec((2, e_block), lambda i: (0, i)),
            pl.BlockSpec((f, n), lambda i: (0, 0)),
        ],
        out_specs=pl.BlockSpec((1, e_block), lambda i: (0, i)),
        compiler_params=pltpu.CompilerParams(dimension_semantics=("parallel",)),
        cost_estimate=cost,
    )(idx, ht)
    return s.reshape(e_pad)[:e]


# ---------------------------------------------------------------------------
# Model wrapper (parameters + forward), mirroring the PyTorch Model
# ---------------------------------------------------------------------------
class Model:
    def __init__(self, in_features, hidden_features, out_features, num_classes, etypes, key):
        # num_classes is unused in the reference forward (kept for signature parity).
        del num_classes
        self.etypes = tuple(etypes)
        R = len(self.etypes)
        fi, fh, fo = in_features, hidden_features, out_features
        self._fi_pad = _round_up(fi, _LANE)
        fh_pad = _round_up(fh, _LANE)
        fo_pad = _round_up(fo, _LANE)

        k1, k2 = jax.random.split(key, 2)
        s1 = (2.0 / (fi + fh)) ** 0.5
        s2 = (2.0 / (fh + fo)) ** 0.5
        w1 = s1 * jax.random.normal(k1, (R, fi, fh), jnp.float32)
        w2 = s2 * jax.random.normal(k2, (R, fh, fo), jnp.float32)
        # Weights stored padded (zero rows/cols) and in bf16: every store is lane-dense and
        # the MXU runs at full rate; padded feature columns stay exactly zero end-to-end.
        self.w1 = jnp.pad(w1, ((0, 0), (0, self._fi_pad - fi), (0, fh_pad - fh))).astype(jnp.bfloat16)
        self.w2 = jnp.pad(w2, ((0, 0), (0, fh_pad - fh), (0, fo_pad - fo))).astype(jnp.bfloat16)
        self.b1 = jnp.zeros((R, fh_pad), jnp.float32)
        self.b2 = jnp.zeros((R, fo_pad), jnp.float32)

    def __call__(self, positive_graph, negative_graph, blocks, x):
        a1, a2 = blocks                                # dense per-relation adjacencies (MFGs)
        if x.shape[1] < self._fi_pad:
            x = jnp.pad(x, ((0, 0), (0, self._fi_pad - x.shape[1])))
        h = rgcn_layer(a1, x, self.w1, self.b1)        # (N1, hidden_pad)
        h = rgcn_layer(a2, h, self.w2, self.b2)        # (N2, out_pad)

        # Fuse all edge-score computations (pos + neg, every etype) into ONE pallas_call.
        keys, srcs, dsts, sizes = [], [], [], []
        for tag, graph in (("pos", positive_graph), ("neg", negative_graph)):
            for et, (s, d) in graph.items():
                keys.append((tag, et))
                srcs.append(s)
                dsts.append(d)
                sizes.append(int(s.shape[0]))
        scores = edge_scores_fused(h, jnp.concatenate(srcs), jnp.concatenate(dsts))

        out = {"pos": {}, "neg": {}}
        off = 0
        for (tag, et), ne in zip(keys, sizes):
            out[tag][et] = scores[off:off + ne].reshape(ne, 1)   # original DGL (E, 1) layout
            off += ne
        return out["pos"], out["neg"]


# ---------------------------------------------------------------------------
if __name__ == "__main__":
    key = jax.random.PRNGKey(0)
    k_adj1, k_adj2, k_x, k_pe, k_ne, k_params = jax.random.split(key, 6)

    etypes = ("follows", "likes")
    R = len(etypes)
    in_features, hidden_features, out_features, num_classes = 16, 32, 32, 4
    N0, N1, N2 = 64, 48, 16        # src of block0, dst of block0 / src of block1, dst of block1
    E_POS, E_NEG = 16, 32

    # Message-flow-graph blocks as dense per-relation adjacency (dst x src), ~30% density.
    a1 = (jax.random.uniform(k_adj1, (R, N1, N0)) < 0.3).astype(jnp.float32)
    a2 = (jax.random.uniform(k_adj2, (R, N2, N1)) < 0.3).astype(jnp.float32)
    blocks = (a1, a2)

    # Input node features for the outermost sampled frontier.
    x = jax.random.normal(k_x, (N0, in_features), jnp.float32)

    # Positive / negative score graphs: per-etype (src, dst) edge lists over the N2 output nodes.
    pe = jax.random.randint(k_pe, (R, 2, E_POS), 0, N2, dtype=jnp.int32)
    ne = jax.random.randint(k_ne, (R, 2, E_NEG), 0, N2, dtype=jnp.int32)
    positive_graph = {et: (pe[i, 0], pe[i, 1]) for i, et in enumerate(etypes)}
    negative_graph = {et: (ne[i, 0], ne[i, 1]) for i, et in enumerate(etypes)}

    # TODO(synk): DGL's dynamic neighbor sampling / local_scope has no Pallas equivalent;
    # graph structure is passed in as dense adjacency + explicit edge-index lists.

    model = Model(in_features, hidden_features, out_features, num_classes, etypes, k_params)
    pos_score, neg_score = model(positive_graph, negative_graph, blocks, x)
    jax.block_until_ready((pos_score, neg_score))

    assert all(v.shape == (E_POS, 1) for v in pos_score.values())
    assert all(v.shape == (E_NEG, 1) for v in neg_score.values())
    assert all(bool(jnp.all(jnp.isfinite(v))) for v in pos_score.values())
    assert all(bool(jnp.all(jnp.isfinite(v))) for v in neg_score.values())
    print("KERNEL_OK")
</pallas_src>

<mosaic_0001>
module attributes {stable_mosaic.version = 11 : i64} {
  func.func @_rgcn_layer_kernel(%arg0: i32, %arg1: memref<2x24x64xbf16, #tpu.memory_space<vmem>>, %arg2: memref<2x24x1xf32, #tpu.memory_space<vmem>>, %arg3: memref<64x128xbf16, #tpu.memory_space<vmem>>, %arg4: memref<256x128xbf16, #tpu.memory_space<vmem>>, %arg5: memref<1x128xf32, #tpu.memory_space<vmem>>, %arg6: memref<24x128xf32, #tpu.memory_space<vmem>>) attributes {dimension_semantics = [#tpu.dimension_semantics<parallel>], iteration_bounds = array<i64: 2>, scalar_prefetch = 0 : i64, scratch_operands = 0 : i64, tpu.core_type = #tpu.core_type<tc>, window_params = [{transform_indices = @transform_0, window_bounds = array<i64: 2, 24, 64>}, {transform_indices = @transform_1, window_bounds = array<i64: 2, 24, 1>}, {pipeline_mode = #tpu.pipeline_mode<synchronous>, transform_indices = @transform_2, window_bounds = array<i64: 64, 128>}, {pipeline_mode = #tpu.pipeline_mode<synchronous>, transform_indices = @transform_3, window_bounds = array<i64: 256, 128>}, {pipeline_mode = #tpu.pipeline_mode<synchronous>, transform_indices = @transform_4, window_bounds = array<i64: 1, 128>}, {transform_indices = @transform_5, window_bounds = array<i64: 24, 128>}]} {
    %c0 = arith.constant 0 : index
    %c0_0 = arith.constant 0 : index
    %0 = vector.load %arg3[%c0, %c0_0] : memref<64x128xbf16, #tpu.memory_space<vmem>>, vector<64x128xbf16>
    %c0_1 = arith.constant 0 : index
    %c0_2 = arith.constant 0 : index
    %c0_3 = arith.constant 0 : index
    %1 = vector.load %arg1[%c0_1, %c0_2, %c0_3] : memref<2x24x64xbf16, #tpu.memory_space<vmem>>, vector<1x24x64xbf16>
    %2 = vector.shape_cast %1 : vector<1x24x64xbf16> to vector<24x64xbf16>
    %cst = arith.constant dense<0.000000e+00> : vector<24x128xf32>
    %3 = tpu.matmul %2, %0, %cst {dimension_numbers = #tpu.dot_dimension_numbers<[1], [0], [0], [1], [0, 0, 1, 1], [], []>} : vector<24x64xbf16>, vector<64x128xbf16>, vector<24x128xf32> -> vector<24x128xf32>
    %c0_4 = arith.constant 0 : index
    %c0_5 = arith.constant 0 : index
    %c0_6 = arith.constant 0 : index
    %4 = vector.load %arg2[%c0_4, %c0_5, %c0_6] : memref<2x24x1xf32, #tpu.memory_space<vmem>>, vector<1x24x1xf32>
    %5 = vector.shape_cast %4 : vector<1x24x1xf32> to vector<24x1xf32>
    %6 = vector.broadcast %5 : vector<24x1xf32> to vector<24x128xf32>
    %7 = arith.mulf %3, %6 : vector<24x128xf32>
    %8 = arith.truncf %7 : vector<24x128xf32> to vector<24x128xbf16>
    %c1 = arith.constant 1 : index
    %c0_7 = arith.constant 0 : index
    %c0_8 = arith.constant 0 : index
    %9 = vector.load %arg1[%c1, %c0_7, %c0_8] : memref<2x24x64xbf16, #tpu.memory_space<vmem>>, vector<1x24x64xbf16>
    %10 = vector.shape_cast %9 : vector<1x24x64xbf16> to vector<24x64xbf16>
    %cst_9 = arith.constant dense<0.000000e+00> : vector<24x128xf32>
    %11 = tpu.matmul %10, %0, %cst_9 {dimension_numbers = #tpu.dot_dimension_numbers<[1], [0], [0], [1], [0, 0, 1, 1], [], []>} : vector<24x64xbf16>, vector<64x128xbf16>, vector<24x128xf32> -> vector<24x128xf32>
    %c1_10 = arith.constant 1 : index
    %c0_11 = arith.constant 0 : index
    %c0_12 = arith.constant 0 : index
    %12 = vector.load %arg2[%c1_10, %c0_11, %c0_12] : memref<2x24x1xf32, #tpu.memory_space<vmem>>, vector<1x24x1xf32>
    %13 = vector.shape_cast %12 : vector<1x24x1xf32> to vector<24x1xf32>
    %14 = vector.broadcast %13 : vector<24x1xf32> to vector<24x128xf32>
    %15 = arith.mulf %11, %14 : vector<24x128xf32>
    %16 = arith.truncf %15 : vector<24x128xf32> to vector<24x128xbf16>
    %17 = tpu.concatenate %8, %16 in 1 : vector<24x128xbf16>, vector<24x128xbf16> -> vector<24x256xbf16>
    %c0_13 = arith.constant 0 : index
    %c0_14 = arith.constant 0 : index
    %18 = vector.load %arg4[%c0_13, %c0_14] : memref<256x128xbf16, #tpu.memory_space<vmem>>, vector<256x128xbf16>
    %cst_15 = arith.constant dense<0.000000e+00> : vector<24x128xf32>
    %19 = tpu.matmul %17, %18, %cst_15 {dimension_numbers = #tpu.dot_dimension_numbers<[1], [0], [0], [1], [0, 0, 1, 1], [], []>} : vector<24x256xbf16>, vector<256x128xbf16>, vector<24x128xf32> -> vector<24x128xf32>
    %c0_16 = arith.constant 0 : index
    %c0_17 = arith.constant 0 : index
    %20 = vector.load %arg5[%c0_16, %c0_17] : memref<1x128xf32, #tpu.memory_space<vmem>>, vector<1x128xf32>
    %21 = vector.broadcast %20 : vector<1x128xf32> to vector<24x128xf32>
    %22 = arith.addf %19, %21 : vector<24x128xf32>
    %c0_18 = arith.constant 0 : index
    %c0_19 = arith.constant 0 : index
    %23 = vector.load %arg6[%c0_18, %c0_19] : memref<24x128xf32, #tpu.memory_space<vmem>>, vector<24x128xf32>
    tpu.vector_store %arg6[%c0_18, %c0_19], %22 {strides = array<i32>} : memref<24x128xf32, #tpu.memory_space<vmem>>, vector<24x128xf32>,
    return
  }
  func.func @transform_0(%arg0: i32) -> (i32, i32, i32) {
    %c0_i32 = arith.constant 0 : i32
    %c0_i32_0 = arith.constant 0 : i32
    %c0_i32_1 = arith.constant 0 : i32
    return %c0_i32, %arg0, %c0_i32_0 : i32, i32, i32
  }
  func.func @transform_1(%arg0: i32) -> (i32, i32, i32) {
    %c0_i32 = arith.constant 0 : i32
    %c0_i32_0 = arith.constant 0 : i32
    %c0_i32_1 = arith.constant 0 : i32
    return %c0_i32, %arg0, %c0_i32_0 : i32, i32, i32
  }
  func.func @transform_2(%arg0: i32) -> (i32, i32) {
    %c0_i32 = arith.constant 0 : i32
    %c0_i32_0 = arith.constant 0 : i32
    %c0_i32_1 = arith.constant 0 : i32
    return %c0_i32, %c0_i32_0 : i32, i32
  }
  func.func @transform_3(%arg0: i32) -> (i32, i32) {
    %c0_i32 = arith.constant 0 : i32
    %c0_i32_0 = arith.constant 0 : i32
    %c0_i32_1 = arith.constant 0 : i32
    return %c0_i32, %c0_i32_0 : i32, i32
  }
  func.func @transform_4(%arg0: i32) -> (i32, i32) {
    %c0_i32 = arith.constant 0 : i32
    %c0_i32_0 = arith.constant 0 : i32
    %c0_i32_1 = arith.constant 0 : i32
    return %c0_i32, %c0_i32_0 : i32, i32
  }
  func.func @transform_5(%arg0: i32) -> (i32, i32) {
    %c0_i32 = arith.constant 0 : i32
    %c0_i32_0 = arith.constant 0 : i32
    return %arg0, %c0_i32 : i32, i32
  }
}

</mosaic_0001>

<bundles_post_ra>
// kernel: tpu_custom_call.1
= control target key start
LH: loop header
LB: loop body
LE: loop exit
PB: predicated region body
PF: predicated region fallthrough
CT: control target
= control target key end

     0   :  { %10 = vsyncpa [#allocation5], 0  ;;  %s1332_s0 = inlined_call_operand.vmem [shape: bf16[2,48,64], index: 0, kind: input, shape index: {}]   ;;  %s1333_s1 = inlined_call_operand.vmem [shape: f32[2,48,1], index: 1, kind: input, shape index: {}]   ;;  %s1334_s2 = inlined_call_operand.vmem [shape: bf16[64,128], index: 2, kind: input, shape index: {}]   ;;  %s1335_s3 = inlined_call_operand.hbm [shape: bf16[256,128], index: 3, kind: input, shape index: {}]   ;;  %s1336_s4 = inlined_call_operand.vmem [shape: f32[1,128], index: 4, kind: input, shape index: {}]   ;;  %s1337_s5 = inlined_call_operand.hbm [shape: f32[48,128], index: 5, kind: output, shape index: {}]  }
   0x1   :  { %11 = vsyncpa [#allocation6], 0 }
   0x2   :  { %13 = vsyncpa [#allocation6 + $0x1], 0  ;;  %s1173_s18 = smov 0   ;;  %s1175_s19 = smov 0  }
   0x3   :  { %s1177_s20 = smov 0   ;;  %s1179_s21 = smov 0  }
   0x4 LB: > { %s1194_s22 = sadd.s32 4294967295, %s1135_s21   ;;  %s842_s23 = sadd.s32 4294967294, %s1135_s21   ;;  %s1135_s21 = sphi %s1179_s21, %s1345_s21   ;;  %s1131_s20 = sphi %s1177_s20, %s1344_s20   ;;  %s1127_s19 = sphi %s1175_s19, %s1343_s19   ;;  %s1123_s18 = sphi %s1173_s18, %s1342_s18  }
   0x5   : > { %s1198_s24 = sadd.s32 1, %s1135_s21   ;;  %s26_s25 = sadd.s32 1, %s1131_s20 }
   0x6   : > { %s23_s26 = ssub.s32 %s1135_s21, %s1198_s24  ;;  %p33_p0 = scmp.ne.s32.totalorder %s1131_s20, %s1127_s19 }
   0x7   : > { %p24_p1 = scmp.eq.s32.totalorder %s23_s26, 0  ;;  %p34_p2 = scmp.eq.s32.totalorder %s1135_s21, 0 }
   0x8   : > { %p152_p3 = scmp.eq.s32.totalorder %s1194_s22, 1  ;;  %p157_p4 = scmp.ne.s32.totalorder %s1127_s19, %s1123_s18 }
   0x9   : > { %s1210_s27 = scalar_select %p24_p1, %s1131_s20, %s26_s25  }
   0xa   : > { %p1212_p5 = por %p34_p2, %p33_p0  ;;  %p1216_p6 = por %p152_p3, %p33_p0 }
   0xb   : > { %p158_p7 = scmp.eq.s32.totalorder %s842_s23, 1  ;;  %p843_p8 = scmp.ge.s32.totalorder %s1135_s21, 1 }
   0xc   : > { %p165_p9 = scmp.lt.s32.totalorder %s1135_s21, 3  ;;  %p994_p11 = scmp.eq.s32.totalorder %s1194_s22, 0 }
   0xd   : > { %p1222_p10 = por %p158_p7, %p157_p4  ;;  %s179_s9 = sshll.u32 %s1335_s3, 4  ;;  %s180_s9 = int_to_ptr.hbm [resolvable:$true] %s179_s9 }
   0xe   : > { %p1227_p12 = pnand %p843_p8, %p165_p9  ;;  %s1137_s10 = smov [#allocation4]  }
   0xf   : > { %s181_s11 = sshll.u32 %s1137_s10, 4  ;;  %s1138_s12 = smov 64   ;;  %s182_s11 = int_to_ptr.vmem [resolvable:$true] %s181_s11 }
  0x10   : > { %p986_p13 = pneg %p1227_p12  ;;  %s1139_s13 = smov 4  }
  0x11   : > { %p845_p1 = scmp.ge.s32.totalorder %s1135_s21, 2 }
  0x12   : > { %p987_p0 = pnand %p994_p11, %p986_p13 }
  0x13   : > { %194 = sbr.rel (%p845_p1) target bundleno = 44 (0x2c), region = 28 }
  0x14   : > { %989 = dma.hbm_to_vmem [thread:$0]  (!%p987_p0), %s180_s9, 2048, %s182_s11, [#allocation5], %s1138_s12, %s1138_s12, %s1139_s13  }
  0x18   : > { %197 = sbr.rel (!%p1212_p5) target bundleno = 33 (0x21), region = 32  ;;  %s199_s14 = sand.u32 (%p1212_p5), 1, %s1131_s20  }
  0x19   : > { %s951_s15 = smul.u32 (%p1212_p5), 12, %s1135_s21 }
  0x1a   : > { %s976_s16 = smul.u32 (%p1212_p5), 24, %s199_s14 }
  0x1b   : > { %s204_s25 = scalar_lea.vmem (%p1212_p5), %s1332_s0, %s951_s15 }
  0x1c   : > { %v221_v0 = vld [vmem:[%s204_s25] sm:$0xff] (%p1212_p5)   ;;  %v225_v1 = vld [vmem:[%s204_s25 + $0x8] sm:$0xf] (%p1212_p5)  ;;  %v227_v2 = vld [vmem:[%s204_s25 + $0x18] sm:$0xff] (%p1212_p5)   ;;  %s201_s26 = scalar_lea.vmem (%p1212_p5), [#allocation2], %s976_s16 }
  0x1d   : > { %222 = vst [vmem:[%s201_s26] sm:$0xff] %v221_v0   ;;  %v231_v3 = vld [vmem:[%s204_s25 + $0x20] sm:$0xf] }
  0x1e   : > { %226 = vst [vmem:[%s201_s26 + $0x8] sm:$0xf] %v225_v1 }
  0x1f   : > { %228 = vst [vmem:[%s201_s26 + $0xc] sm:$0xff] %v227_v2  }
  0x20   : > { %232 = vst [vmem:[%s201_s26 + $0x14] sm:$0xf] %v231_v3 }
  0x21 PF: > { %268 = sbr.rel (!%p1212_p5) target bundleno = 44 (0x2c), region = 73  ;;  %s270_s7 = sand.u32 (%p1212_p5), 1, %s1131_s20  }
  0x22   : > { %s952_s8 = smul.u32 (%p1212_p5), 24, %s1135_s21 }
  0x23   : > { %s977_s9 = smul.u32 (%p1212_p5), 48, %s270_s7 }
  0x24   : > { %s275_s12 = scalar_lea.vmem (%p1212_p5), %s1333_s1, %s952_s8 }
  0x25   : > { %v314_v4 = vld [vmem:[%s275_s12] sm:$0xff] (%p1212_p5)  ;;  %v316_v5 = vld [vmem:[%s275_s12 + $0x8] sm:$0xff] (%p1212_p5)  ;;  %v318_v6 = vld [vmem:[%s275_s12 + $0x10] sm:$0xff] (%p1212_p5)  ;;  %s272_s13 = scalar_lea.vmem (%p1212_p5), [#allocation3], %s977_s9 }
  0x26   : > { %315 = vst [vmem:[%s272_s13] sm:$0xff] %v314_v4  ;;  %v320_v7 = vld [vmem:[%s275_s12 + $0x30] sm:$0xff]  ;;  %v322_v8 = vld [vmem:[%s275_s12 + $0x38] sm:$0xff]  ;;  %v324_v9 = vld [vmem:[%s275_s12 + $0x40] sm:$0xff] }
  0x27   : > { %317 = vst [vmem:[%s272_s13 + $0x8] sm:$0xff] %v316_v5 }
  0x28   : > { %319 = vst [vmem:[%s272_s13 + $0x10] sm:$0xff] %v318_v6 }
  0x29   : > { %321 = vst [vmem:[%s272_s13 + $0x18] sm:$0xff] %v320_v7 }
  0x2a   : > { %323 = vst [vmem:[%s272_s13 + $0x20] sm:$0xff] %v322_v8 }
  0x2b   : > { %325 = vst [vmem:[%s272_s13 + $0x28] sm:$0xff] %v324_v9 }
  0x2c PF: > { %334 = sbr.rel (%p1227_p12) target bundleno = 366 (0x16e), region = 111  ;;  %s1258_s28 = sand.u32 (!%p1227_p12), 1, %s1127_s19  }
  0x2d   : > { %s978_s14 = smul.u32 (!%p1227_p12), 24, %s1258_s28 }
  0x2e   : > { %s979_s15 = smul.u32 (!%p1227_p12), 48, %s1258_s28 }
  0x2f   : > { %s1264_s16 = scalar_lea.vmem (!%p1227_p12), [#allocation2], %s978_s14 }
  0x30   : > { %s1266_s17 = scalar_lea.vmem (!%p1227_p12), [#allocation3], %s979_s15 }
  0x31   : > { %1114 = dma.done.wait (%p994_p11), [#allocation5], 2048  }
  0x32   : > { %1116 = vsyncadd (%p994_p11), [#allocation5], 4294965248  ;;  %v1140_v10 = vmov 0   ;;  %v956_v11 = vld [vmem:[%s1334_s2 + $0x18] sm:$0xff]  ;;  %v955_v12 = vld [vmem:[%s1334_s2 + $0x10] sm:$0xff]  ;;  %vm427_vm0 = vcmask 523264  }
  0x33   : > { %1036 = vset.pattern.permute.xlu1 %v1140_v10  ;;  %1035 = vset.pattern.permute.xlu0 %v1140_v10  ;;  %v881_v13 = vld [vmem:[%s1266_s17 + $0x18] sm:$0xff]  ;;  %v452_v14 = vld [vmem:[%s1266_s17] sm:$0xff]  ;;  %v454_v15 = vld [vmem:[%s1266_s17 + $0x10] sm:$0xff]  ;;  %s379_s13 = scalar_lea.vmem [#allocation7], %s978_s14  ;;  %s975_s15 = smul.u32 24, %s1194_s22 }
  0x34   : > { %1037 = vset.pattern.permute.xlu2 %v1140_v10  ;;  %438 = vmatpush.bf16.msra.mxu0 %v956_v11  ;;  %v966_v16 = vld [vmem:[#allocation4 + $0x38] sm:$0xff]  ;;  %v882_v19 = vld [vmem:[%s1266_s17 + $0x20] sm:$0xff]  ;;  %v957_v25 = vld [vmem:[%s1264_s16] sm:$0xff]  ;;  %s741_s23 = sshll.u32 %s379_s13, 4  ;;  %s729_s14 = scalar_lea.sflag [#allocation6], %s1258_s28  ;;  %s742_s23 = int_to_ptr.vmem [resolvable:$true] %s741_s23 }
  0x35   : > { %498 = vmatpush.bf16.msra.mxu1 %v956_v11  ;;  %518 = vperm.xlu1 %1036, %v881_v13   ;;  %v974_v17 = vld [vmem:[#allocation4 + $0x78] sm:$0xff]  ;;  %v965_v21 = vld [vmem:[#allocation4 + $0x30] sm:$0xff]  ;;  %v964_v33 = vld [vmem:[#allocation4 + $0x28] sm:$0xff]  ;;  %s740_s6 = scalar_lea.hbm %s1337_s5, %s975_s15  ;;  %s1089_s9 = scalar_lea.hbm %s1337_s5, 48 }
  0x36   : > { %457 = vperm.xlu0 %1035, %v452_v14   ;;  %467 = vperm.xlu2 %1037, %v454_v15   ;;  %v954_v18 = vld [vmem:[%s1334_s2 + $0x8] sm:$0xff]  ;;  %v973_v22 = vld [vmem:[#allocation4 + $0x70] sm:$0xff]  ;;  %v972_v34 = vld [vmem:[#allocation4 + $0x68] sm:$0xff]  ;;  %s743_s25 = sshll.u32 %s740_s6, 4  ;;  %s744_s25 = int_to_ptr.hbm [resolvable:$true] %s743_s25 }
  0x37   : > { %689 = vmatpush.bf16.msra.mxu2 %v966_v16  ;;  %707 = vmatpush.bf16.msra.mxu3 %v974_v17  ;;  %v453_v20 = vld [vmem:[%s1266_s17 + $0x8] sm:$0xff]  ;;  %v953_v23 = vld [vmem:[%s1334_s2] sm:$0xff]  ;;  %v963_v35 = vld [vmem:[#allocation4 + $0x20] sm:$0xff]  ;;  %s1083_s26 = sshra.s32 %s744_s25, 4  ;;  %s1084_s26 = int_to_ptr.hbm [resolvable:$true] %s1083_s26 }
  0x38   : > { %439 = vmatpush.bf16.msra.mxu0 %v955_v12  ;;  %v883_v24 = vld [vmem:[%s1266_s17 + $0x28] sm:$0xff]  ;;  %v394_v27 = vld [vmem:[%s1264_s16 + $0x8] sm:$0xf]  ;;  %v971_v36 = vld [vmem:[#allocation4 + $0x60] sm:$0xff]  ;;  %s1085_s22 = scalar_lea.hbm %s1084_s26, 24  ;;  %p1090_p5 = scmp.lt.s32.totalorder %s1084_s26, %s1337_s5 }
  0x39   : > { %499 = vmatpush.bf16.msra.mxu1 %v955_v12  ;;  %v958_v26 = vld [vmem:[%s1264_s16 + $0xc] sm:$0xff]  ;;  %v874_v28 = vld [vmem:[%s1264_s16 + $0x14] sm:$0xf]  ;;  %v400_v29 = vunpack.c.l.b16 %v394_v27  ;;  %v960_v41 = vld [vmem:[#allocation4 + $0x8] sm:$0xff]  ;;  %p1086_p2 = scmp.ne.s32.totalorder %s1084_s26, %s1085_s22  ;;  %p1091_p7 = scmp.lt.s32.totalorder %s1089_s9, %s1085_s22 }
  0x3a   : > { %v485_v30 = vunpack.c.l.b16 %v874_v28  ;;  %v962_v37 = vld [vmem:[#allocation4 + $0x18] sm:$0xff]  ;;  %v961_v39 = vld [vmem:[#allocation4 + $0x10] sm:$0xff]  ;;  %v968_v42 = vld [vmem:[#allocation4 + $0x48] sm:$0xff] }
  0x3b   : > { %690 = vmatpush.bf16.msra.mxu2 %v965_v21  ;;  %708 = vmatpush.bf16.msra.mxu3 %v973_v22  ;;  %v402_v31 = vpack.c.b16 %v400_v29, %v400_v29  ;;  %v970_v38 = vld [vmem:[#allocation4 + $0x58] sm:$0xff]  ;;  %v969_v40 = vld [vmem:[#allocation4 + $0x50] sm:$0xff]  ;;  %v959_v43 = vld [vmem:[#allocation4] sm:$0xff]  ;;  %p1087_p3 = pnand %p1086_p2, %p1216_p6  ;;  %p1092_p8 = por %p1091_p7, %p1090_p5 }
  0x3c   : > { %440 = vmatpush.bf16.msra.mxu0 %v954_v18  ;;  %v487_v32 = vpack.c.b16 %v485_v30, %v485_v30  ;;  %v967_v44 = vld [vmem:[#allocation4 + $0x40] sm:$0xff]  ;;  %v1038_v17 = vld [vmem:[%s1336_s4] ss:$0 sm:$0xff] }
  0x3d   : > { %500 = vmatpush.bf16.msra.mxu1 %v954_v18  ;;  %523 = vperm.xlu1 %1036, %v882_v19   ;;  %p1088_p4 = pneg %p1087_p3 }
  0x3e   : > { %462 = vperm.xlu0 %1035, %v453_v20   ;;  %528 = vperm.xlu2 %1037, %v883_v24  }
  0x3f   : > { %691 = vmatpush.bf16.msra.mxu2 %v964_v33  ;;  %709 = vmatpush.bf16.msra.mxu3 %v972_v34  ;;  %p1093_p9 = pnand %p1092_p8, %p1088_p4 }
  0x40   : > { %441 = vmatpush.bf16.msra.mxu0 %v953_v23 }
  0x41   : > { %501 = vmatpush.bf16.msra.mxu1 %v953_v23 }
  0x43   : > { %870 = vmatmul.msk.bf16.vlgmr.msra.gmra.mxu0 %vm427_vm0, %v957_v25  ;;  %692 = vmatpush.bf16.msra.mxu2 %v963_v35 }
  0x44   : > { %879 = vmatmul.msk.bf16.vlgmr.msra.gmra.mxu1 %vm427_vm0, %v958_v26  ;;  %710 = vmatpush.bf16.msra.mxu3 %v971_v36 }
  0x47   : > { %693 = vmatpush.bf16.msra.mxu2 %v962_v37 }
  0x48   : > { %711 = vmatpush.bf16.msra.mxu3 %v970_v38 }
  0x4b   : > { %694 = vmatpush.bf16.msra.mxu2 %v961_v39 }
  0x4c   : > { %712 = vmatpush.bf16.msra.mxu3 %v969_v40 }
  0x4f   : > { %695 = vmatpush.bf16.msra.mxu2 %v960_v41 }
  0x50   : > { %713 = vmatpush.bf16.msra.mxu3 %v968_v42 }
  0x53   : > { %871 = vmatmul.msk.bf16.gmra.mxu0 %vm427_vm0, %v402_v31  ;;  %696 = vmatpush.bf16.msra.mxu2 %v959_v43 }
  0x54   : > { %880 = vmatmul.msk.bf16.gmra.mxu1 %vm427_vm0, %v487_v32  ;;  %714 = vmatpush.bf16.msra.mxu3 %v967_v44 }
  0x90   : > { %v468_v51 = vpop.permute.xlu2 %467 }
  0x98   : > { %v529_v2 = vpop.permute.xlu2 %528 }
  0xa7   : > { %v519_v45 = vpop.permute.xlu1 %518 }
  0xa8   : > { %v458_v46 = vpop.permute.xlu0 %457 }
  0xaf   : > { %v524_v52 = vpop.permute.xlu1 %523 }
  0xb0   : > { %v463_v53 = vpop.permute.xlu0 %462 }
  0xc0   : > { %v443_v47 = vpop.f32.mrf.mxu0 }
  0xc1   : > { %v503_v48 = vpop.f32.mrf.mxu1  ;;  %v470_v49 = vmul.f32 %v458_v46, %v443_v47 }
  0xc2   : > { %v531_v50 = vmul.f32 %v519_v45, %v503_v48 }
  0xc3   : > { %v473_v56 = vpack.c.bf16 %v470_v49, %v470_v49 }
  0xc4   : > { %v534_v57 = vpack.c.bf16 %v531_v50, %v531_v50 }
  0xc5   : > { %v540_v62 = vunpack.c.l.b16 %v473_v56 }
  0xc6   : > { %v550_v63 = vunpack.c.l.b16 %v534_v57 }
  0xc8   : > { %v445_v54 = vpop.f32.mrf.mxu0 }
  0xc9   : > { %v505_v55 = vpop.f32.mrf.mxu1  ;;  %v471_v58 = vmul.f32 %v463_v53, %v445_v54 }
  0xca   : > { %v532_v59 = vmul.f32 %v524_v52, %v505_v55 }
  0xcb   : > { %v474_v60 = vpack.c.bf16 %v471_v58, %v471_v58 }
  0xcc   : > { %v535_v61 = vpack.c.bf16 %v532_v59, %v532_v59 }
  0xcd   : > { %v541_v0 = vunpack.c.l.b16 %v474_v60 }
  0xce   : > { %v551_v1 = vunpack.c.l.b16 %v535_v61 }
  0xcf   : > { %v543_v3 = vpack.c.b16 %v541_v0, %v540_v62 }
  0xd0   : > { %v553_v4 = vpack.c.b16 %v551_v1, %v550_v63  ;;  %v448_v5 = vpop.f32.mrf.mxu0 }
  0xd1   : > { %v508_v6 = vpop.f32.mrf.mxu1  ;;  %697 = vmatmul.bf16.vlgmr.msra.gmra.mxu2 %v543_v3  ;;  %v472_v7 = vmul.f32 %v468_v51, %v448_v5 }
  0xd2   : > { %715 = vmatmul.bf16.vlgmr.msra.gmra.mxu3 %v553_v4  ;;  %v533_v8 = vmul.f32 %v529_v2, %v508_v6 }
  0xd3   : > { %v475_v9 = vpack.c.bf16 %v472_v7, %v472_v7 }
  0xd4   : > { %v536_v10 = vpack.c.bf16 %v533_v8, %v533_v8 }
  0xd5   : > { %v542_v13 = vunpack.c.l.b16 %v475_v9 }
  0xd6   : > { %v552_v14 = vunpack.c.l.b16 %v536_v10 }
  0xd7   : > { %v544_v15 = vpack.c.b16 %v542_v13, %v542_v13 }
  0xd8   : > { %v450_v11 = vpop.f32.mrf.mxu0  ;;  %v554_v16 = vpack.c.b16 %v552_v14, %v552_v14 }
  0xd9   : > { %v510_v12 = vpop.f32.mrf.mxu1 }
  0xe1   : > { %702 = vmatmul.bf16.gmra.mxu2 %v544_v15 }
  0xe2   : > { %720 = vmatmul.bf16.gmra.mxu3 %v554_v16 }
 0x154   : > { %v698_v18 = vpop.f32.mrf.mxu2 }
 0x155   : > { %v716_v19 = vpop.f32.mrf.mxu3  ;;  %v699_v20 = vadd.f32 %v1038_v17, %v698_v18 }
 0x157   : > { %v717_v21 = vadd.f32 %v716_v19, %v699_v20 }
 0x159   : > { %725 = vst [vmem:[%s379_s13] sm:$0xff] %v717_v21 }
 0x15c   : > { %v700_v22 = vpop.f32.mrf.mxu2 }
 0x15d   : > { %v718_v23 = vpop.f32.mrf.mxu3  ;;  %v701_v24 = vadd.f32 %v1038_v17, %v700_v22 }
 0x15f   : > { %v719_v25 = vadd.f32 %v718_v23, %v701_v24 }
 0x161   : > { %726 = vst [vmem:[%s379_s13 + $0x8] sm:$0xff] %v719_v25 }
 0x164   : > { %v703_v26 = vpop.f32.mrf.mxu2 }
 0x165   : > { %v721_v27 = vpop.f32.mrf.mxu3  ;;  %v704_v28 = vadd.f32 %v1038_v17, %v703_v26 }
 0x167   : > { %v722_v29 = vadd.f32 %v721_v27, %v704_v28 }
 0x169   : > { %727 = vst [vmem:[%s379_s13 + $0x10] sm:$0xff] %v722_v29 }
 0x16a   : > { %1096 = shalt.err (!%p1093_p9)
}
 0x16b   : > { %s1141_s28 = smov 128   ;;  %s1142_s12 = smov 8  }
 0x16c   : > { %984 = dma.vmem_to_hbm [thread:$0]  (%p1216_p6), %s742_s23, 384, %s744_s25, %s729_s14, %s1141_s28, %s1141_s28, %s1142_s12   ;;  %v705_v30 = vpop.f32.mrf.mxu2 }
 0x16d   : > { %v723_v31 = vpop.f32.mrf.mxu3 }
 0x16e PF: > { %s758_s13 = sand.u32 1, %s1123_s18   ;;  %p991_p11 = pnand %p845_p1, %p1222_p10 }
 0x16f   : > { %s759_s15 = scalar_lea.sflag [#allocation6], %s758_s13 }
 0x170   : > { %p992_p12 = pneg %p991_p11 }
 0x172   : > { %1118 = dma.done.wait (%p992_p12), %s759_s15, 384  }
 0x173   : > { %1120 = vsyncadd (%p992_p12), %s759_s15, 4294966912  ;;  %p16_p6 = scmp.ge.s32.totalorder %s1198_s24, 4   ;;  %s1342_s18 = smov %s1127_s19 }
 0x174   : > { %s1343_s19 = smov %s1131_s20  ;;  %s1344_s20 = smov %s1210_s27 }
 0x175   : > { %s1345_s21 = smov %s1198_s24  ;;  %18 = sbr.rel (!%p16_p6) target bundleno = 4 (0x4), region = 174 }
 0x17a   :  { %765 = vsyncpa [#allocation5], 1 }
 0x17b   :  { %767 = vsyncpa [#allocation5 + $0x1], 1 }
 0x17c   :  { %768 = vsyncpa [#allocation6], 1 }
 0x17d   :  { %770 = vsyncpa [#allocation6 + $0x1], 1 }

</bundles_post_ra>
